<compile_context>
chip_gen: v7x
topology: tpu7x:2x2x1
jax: 0.10.0
libtpu: 0.0.40
codegen_flags: <defaults>
</compile_context>

<pallas_src>
import jax
import jax.numpy as jnp
from jax.experimental import pallas as pl
from jax.experimental.pallas import tpu as pltpu


def _round_up(x, m):
    return (x + m - 1) // m * m


def _vmem_budget():
    """(activation budget for batch-tile sizing, vmem_limit cap) per TPU generation."""
    cap = 64 << 20                      # assume smallest VMEM (v7x) if the query fails
    try:
        cap = int(getattr(pltpu.get_tpu_info(), "vmem_capacity_bytes", cap))
    except Exception:
        pass
    if cap >= (96 << 20):               # v5e / v6e: 128 MiB VMEM per core
        return 48 << 20, 96 << 20
    return 14 << 20, 40 << 20           # v7x: 64 MiB VMEM -> keep headroom


def _pick_batch_tile(batch, per_sample_bytes, budget_bytes):
    """Multiple-of-8 batch tile under the VMEM budget; keep >=2 grid steps when possible."""
    b8 = _round_up(batch, 8)
    cap = max(8, (budget_bytes // max(per_sample_bytes, 1)) // 8 * 8)
    tb = min(cap, b8, 1024)
    if b8 >= 16:                        # >=2 grid steps: v7x has 2 TCs; also enables pipelining
        tb = min(tb, max(8, (b8 // 2) // 8 * 8))
    return max(8, tb)


def cnn_kernel(slab_ref, wc_ref, bcm_ref, wm_ref, bm_ref, wo_ref, bo_ref, out_ref):
    """Fused conv(all widths)/ReLU/maxpool + 2-layer MLP + sigmoid for one batch tile."""
    # One MXU matmul fusing every conv width: (TB, T, KE_pad) x (KE_pad, CH) -> f32.
    conv = jax.lax.dot_general(slab_ref[...], wc_ref[...], (((2,), (0,)), ((), ())),
                               preferred_element_type=jnp.float32)     # (TB, T, CH)
    # Fused bias + validity mask (-1e30 on invalid (t, width) slots) then ReLU:
    # invalid positions become exactly 0 -> safe identity for the time max-pool.
    conv = jnp.maximum(conv + bcm_ref[...], 0.0)
    feat = jnp.max(conv, axis=1)                                        # (TB, CH)
    h = jnp.dot(feat.astype(jnp.bfloat16), wm_ref[...],
                preferred_element_type=jnp.float32) + bm_ref[...]
    logits = jnp.dot(h.astype(jnp.bfloat16), wo_ref[...],
                     preferred_element_type=jnp.float32) + bo_ref[...]
    out_ref[...] = jax.nn.sigmoid(logits)


def pack_cnn(params, kernel_sizes, seq_len):
    """One-time packing of all weights/masks into lane-dense, kernel-ready layouts."""
    kernel_sizes = tuple(int(k) for k in kernel_sizes)
    k_max, k_min = max(kernel_sizes), min(kernel_sizes)
    n_k = len(kernel_sizes)
    L = int(seq_len)
    E = params["embedding"].shape[1]
    C = params[f"conv{kernel_sizes[0]}_w"].shape[-1]
    H = params["mlp1_w"].shape[-1]
    CS = params["out_w"].shape[-1]

    T_pad = _round_up(L - k_min + 1, 16)     # padded conv-output length (sublane friendly)
    KE = k_max * E
    KE_pad = _round_up(KE, 128)              # lane-dense contracted dim (160 -> 256)
    CH = _round_up(n_k * C, 128)             # fused conv output channels
    Hp = _round_up(H, 128)
    CSp = _round_up(CS, 128)

    # Fused conv weights: per-width (k*E, C) blocks zero-padded into (KE_pad, CH).
    wc = jnp.zeros((KE_pad, CH), jnp.float32)
    # Fused conv bias + time-validity mask: bias on valid rows, -1e30 on invalid ones.
    bcm = jnp.full((T_pad, CH), -1e30, jnp.float32)
    t_idx = jnp.arange(T_pad)[:, None]
    for g, k in enumerate(kernel_sizes):
        c0, c1 = g * C, (g + 1) * C
        wc = wc.at[: k * E, c0:c1].set(params[f"conv{k}_w"])
        valid = t_idx < (L - k + 1)                                     # (T_pad, 1)
        b = jnp.broadcast_to(params[f"conv{k}_b"].reshape(1, C), (T_pad, C))
        bcm = bcm.at[:, c0:c1].set(jnp.where(valid, b, -1e30))

    wm = jnp.zeros((CH, Hp), jnp.float32).at[: n_k * C, :H].set(params["mlp1_w"])
    bm = jnp.zeros((1, Hp), jnp.float32).at[:, :H].set(params["mlp1_b"])
    wo = jnp.zeros((Hp, CSp), jnp.float32).at[:H, :CS].set(params["out_w"])
    bo = jnp.zeros((1, CSp), jnp.float32).at[:, :CS].set(params["out_b"])

    # Window-index table for the wrapper-side im2col gather.  Indices are clamped
    # to [0, L-1]; clamped offsets only ever multiply zero rows of wc, and fully
    # invalid time positions are killed by the -1e30 in bcm, so clamping is exact.
    k_win = KE_pad // E if KE_pad % E == 0 else k_max   # gather straight at padded width
    window_idx = jnp.minimum(jnp.arange(T_pad)[:, None] + jnp.arange(k_win)[None, :],
                             L - 1).astype(jnp.int32)

    packed = {
        "emb": params["embedding"].astype(jnp.bfloat16),
        "wc": wc.astype(jnp.bfloat16), "bcm": bcm,
        "wm": wm.astype(jnp.bfloat16), "bm": bm,
        "wo": wo.astype(jnp.bfloat16), "bo": bo,
        "window_idx": window_idx,
    }
    meta = dict(L=L, E=E, CS=CS, T_pad=T_pad, KE=KE, KE_pad=KE_pad, CH=CH,
                Hp=Hp, CSp=CSp, k_win=k_win)
    return jax.device_put(packed), meta


def build_cnn_forward(params, kernel_sizes, seq_len):
    """Returns a jitted forward: data (B, L) int32 token ids -> sigmoid probs (B, CS)."""
    packed, meta = pack_cnn(params, kernel_sizes, seq_len)
    act_budget, limit_cap = _vmem_budget()
    T_pad, KE_pad, CH = meta["T_pad"], meta["KE_pad"], meta["CH"]
    Hp, CSp, CS = meta["Hp"], meta["CSp"], meta["CS"]
    E, k_win = meta["E"], meta["k_win"]

    weight_bytes = sum(int(a.size) * a.dtype.itemsize
                       for n, a in packed.items() if n not in ("emb", "window_idx"))
    per_sample = (2 * T_pad * KE_pad * 2     # double-buffered bf16 im2col slab tile
                  + T_pad * CH * 4           # conv activations (f32)
                  + (CH + Hp) * 4            # pooled features / hidden (f32)
                  + 2 * CSp * 4)             # double-buffered output tile

    @jax.jit
    def forward(data):
        B, L = data.shape
        assert L == meta["L"], "sequence length must match the packed constants"
        TB = _pick_batch_tile(B, per_sample, act_budget)
        B_pad = _round_up(B, TB)
        grid = (B_pad // TB,)

        # Dropout is identity (eval mode).  Pad the batch with token 0 rows.
        data_p = jnp.pad(data, ((0, B_pad - B), (0, 0)))
        # Wrapper-side im2col: one gather produces the lane-dense slab directly.
        tok = data_p[:, packed["window_idx"]]                         # (B_pad, T_pad, k_win)
        slab = jnp.take(packed["emb"], tok, axis=0).reshape(B_pad, T_pad, k_win * E)
        if k_win * E < KE_pad:
            slab = jnp.pad(slab, ((0, 0), (0, 0), (0, KE_pad - k_win * E)))

        vmem_limit = int(min(max(weight_bytes + TB * per_sample + (4 << 20),
                                 32 << 20), limit_cap))

        out = pl.pallas_call(
            cnn_kernel,
            out_shape=jax.ShapeDtypeStruct((B_pad, CSp), jnp.float32),
            grid=grid,
            in_specs=[
                pl.BlockSpec((TB, T_pad, KE_pad), lambda b: (b, 0, 0)),  # streamed slab tile
                pl.BlockSpec((KE_pad, CH), lambda b: (0, 0)),            # fused conv W (resident)
                pl.BlockSpec((T_pad, CH), lambda b: (0, 0)),             # fused conv bias + mask
                pl.BlockSpec((CH, Hp), lambda b: (0, 0)),                # mlp1 W
                pl.BlockSpec((1, Hp), lambda b: (0, 0)),                 # mlp1 b
                pl.BlockSpec((Hp, CSp), lambda b: (0, 0)),               # out W
                pl.BlockSpec((1, CSp), lambda b: (0, 0)),                # out b
            ],
            out_specs=pl.BlockSpec((TB, CSp), lambda b: (b, 0)),
            compiler_params=pltpu.CompilerParams(
                dimension_semantics=("parallel",),
                vmem_limit_bytes=vmem_limit),
        )(slab, packed["wc"], packed["bcm"], packed["wm"], packed["bm"],
          packed["wo"], packed["bo"])
        return out[:B, :CS]

    return forward


def reference_forward(data, params, kernel_sizes):
    """Plain-JAX f32 reference matching the PyTorch forward semantics."""
    emb = jnp.take(params["embedding"], data, axis=0)
    B, L, E = emb.shape
    pooled = []
    for k in kernel_sizes:
        w = params[f"conv{k}_w"]
        b = params[f"conv{k}_b"]
        T = L - k + 1
        acc = jnp.zeros((B, T, w.shape[-1]), jnp.float32)
        for j in range(k):
            acc = acc + jnp.einsum("bte,ec->btc", emb[:, j:j + T, :],
                                   w[j * E:(j + 1) * E, :])
        acc = jnp.maximum(acc + b, 0.0)
        pooled.append(jnp.max(acc, axis=1))
    feat = jnp.concatenate(pooled, axis=-1)
    h = feat @ params["mlp1_w"] + params["mlp1_b"]
    logits = h @ params["out_w"] + params["out_b"]
    return jax.nn.sigmoid(logits)


def init_params(key, vocab_size, embed_size, kernel_num, kernel_sizes,
                mlp1_hidden, class_size):
    """Deterministic synthetic init (xavier_normal-style scaling)."""
    keys = jax.random.split(key, 3 + len(kernel_sizes))
    params = {}
    emb = jax.random.normal(keys[0], (vocab_size, embed_size), jnp.float32)
    emb = emb * jnp.sqrt(2.0 / (vocab_size + embed_size))
    emb = emb.at[0].set(0.0)                 # row 0 = <pad>
    params["embedding"] = emb
    for i, k in enumerate(kernel_sizes):
        fan_in = k * embed_size
        w = jax.random.normal(keys[1 + i], (fan_in, kernel_num), jnp.float32)
        params[f"conv{k}_w"] = w * jnp.sqrt(2.0 / (fan_in + kernel_num))
        params[f"conv{k}_b"] = jnp.zeros((1, kernel_num), jnp.float32)
    d_in = len(kernel_sizes) * kernel_num
    wm = jax.random.normal(keys[-2], (d_in, mlp1_hidden), jnp.float32)
    params["mlp1_w"] = wm * jnp.sqrt(2.0 / (d_in + mlp1_hidden))
    params["mlp1_b"] = jnp.zeros((1, mlp1_hidden), jnp.float32)
    wo = jax.random.normal(keys[-1], (mlp1_hidden, class_size), jnp.float32)
    params["out_w"] = wo * jnp.sqrt(2.0 / (mlp1_hidden + class_size))
    params["out_b"] = jnp.zeros((1, class_size), jnp.float32)
    return params


if __name__ == "__main__":
    vocab_size = 50
    embed_size = 32            # opt.embedding_dim
    kernel_num = 8             # opt.kernel_num (out_channels)
    kernel_sizes = [3, 4, 5]   # opt.kernel_sizes = "3,4,5"
    mlp1_hidden = 32           # opt.mlp1_hidden_size
    class_size = 4             # opt.class_size
    B, L = 2, 16

    key = jax.random.PRNGKey(0)
    k_param, k_data = jax.random.split(key)
    params = init_params(k_param, vocab_size, embed_size, kernel_num,
                         kernel_sizes, mlp1_hidden, class_size)
    data = jax.random.randint(k_data, (B, L), 0, vocab_size, dtype=jnp.int32)

    cnn_forward = build_cnn_forward(params, kernel_sizes, seq_len=L)   # one-time packing
    out = jax.block_until_ready(cnn_forward(data))
    ref = jax.block_until_ready(reference_forward(data, params, kernel_sizes))

    assert out.shape == (B, class_size), out.shape
    assert bool(jnp.all(jnp.isfinite(out))) and bool(jnp.all((out >= 0) & (out <= 1)))
    max_err = float(jnp.max(jnp.abs(out - ref)))
    assert max_err < 2e-2, f"mismatch vs f32 reference: {max_err}"
    print("KERNEL_OK")
</pallas_src>

<mosaic_0001>
module attributes {stable_mosaic.version = 11 : i64} {
  func.func @cnn_kernel(%arg0: i32, %arg1: memref<8x16x256xbf16, #tpu.memory_space<vmem>>, %arg2: memref<256x128xbf16, #tpu.memory_space<vmem>>, %arg3: memref<16x128xf32, #tpu.memory_space<vmem>>, %arg4: memref<128x128xbf16, #tpu.memory_space<vmem>>, %arg5: memref<1x128xf32, #tpu.memory_space<vmem>>, %arg6: memref<128x128xbf16, #tpu.memory_space<vmem>>, %arg7: memref<1x128xf32, #tpu.memory_space<vmem>>, %arg8: memref<8x128xf32, #tpu.memory_space<vmem>>) attributes {dimension_semantics = [#tpu.dimension_semantics<parallel>], iteration_bounds = array<i64: 1>, scalar_prefetch = 0 : i64, scratch_operands = 0 : i64, tpu.core_type = #tpu.core_type<tc>, window_params = [{transform_indices = @transform_0, window_bounds = array<i64: 8, 16, 256>}, {pipeline_mode = #tpu.pipeline_mode<synchronous>, transform_indices = @transform_1, window_bounds = array<i64: 256, 128>}, {pipeline_mode = #tpu.pipeline_mode<synchronous>, transform_indices = @transform_2, window_bounds = array<i64: 16, 128>}, {pipeline_mode = #tpu.pipeline_mode<synchronous>, transform_indices = @transform_3, window_bounds = array<i64: 128, 128>}, {pipeline_mode = #tpu.pipeline_mode<synchronous>, transform_indices = @transform_4, window_bounds = array<i64: 1, 128>}, {pipeline_mode = #tpu.pipeline_mode<synchronous>, transform_indices = @transform_5, window_bounds = array<i64: 128, 128>}, {pipeline_mode = #tpu.pipeline_mode<synchronous>, transform_indices = @transform_6, window_bounds = array<i64: 1, 128>}, {transform_indices = @transform_7, window_bounds = array<i64: 8, 128>}]} {
    %c0 = arith.constant 0 : index
    %c0_0 = arith.constant 0 : index
    %c0_1 = arith.constant 0 : index
    %0 = vector.load %arg1[%c0, %c0_0, %c0_1] : memref<8x16x256xbf16, #tpu.memory_space<vmem>>, vector<8x16x256xbf16>
    %c0_2 = arith.constant 0 : index
    %c0_3 = arith.constant 0 : index
    %1 = vector.load %arg2[%c0_2, %c0_3] : memref<256x128xbf16, #tpu.memory_space<vmem>>, vector<256x128xbf16>
    %cst = arith.constant dense<0.000000e+00> : vector<8x16x128xf32>
    %2 = tpu.matmul %0, %1, %cst {dimension_numbers = #tpu.dot_dimension_numbers<[2], [0], [0, 1], [1], [0, 0, 0, 1, 1, 1], [], []>} : vector<8x16x256xbf16>, vector<256x128xbf16>, vector<8x16x128xf32> -> vector<8x16x128xf32>
    %c0_4 = arith.constant 0 : index
    %c0_5 = arith.constant 0 : index
    %3 = vector.load %arg3[%c0_4, %c0_5] : memref<16x128xf32, #tpu.memory_space<vmem>>, vector<16x128xf32>
    %4 = vector.shape_cast %3 : vector<16x128xf32> to vector<1x16x128xf32>
    %5 = vector.broadcast %4 : vector<1x16x128xf32> to vector<8x16x128xf32>
    %6 = arith.addf %2, %5 : vector<8x16x128xf32>
    %cst_6 = arith.constant 0.000000e+00 : f32
    %7 = vector.broadcast %cst_6 : f32 to vector<8x16x128xf32>
    %8 = arith.maximumf %6, %7 : vector<8x16x128xf32>
    %cst_7 = arith.constant dense<0xFF800000> : vector<8x128xf32>
    %9 = vector.multi_reduction <maximumf>, %8, %cst_7 [1] : vector<8x16x128xf32> to vector<8x128xf32>
    %10 = arith.truncf %9 : vector<8x128xf32> to vector<8x128xbf16>
    %c0_8 = arith.constant 0 : index
    %c0_9 = arith.constant 0 : index
    %11 = vector.load %arg4[%c0_8, %c0_9] : memref<128x128xbf16, #tpu.memory_space<vmem>>, vector<128x128xbf16>
    %cst_10 = arith.constant dense<0.000000e+00> : vector<8x128xf32>
    %12 = tpu.matmul %10, %11, %cst_10 {dimension_numbers = #tpu.dot_dimension_numbers<[1], [0], [0], [1], [0, 0, 1, 1], [], []>} : vector<8x128xbf16>, vector<128x128xbf16>, vector<8x128xf32> -> vector<8x128xf32>
    %c0_11 = arith.constant 0 : index
    %c0_12 = arith.constant 0 : index
    %13 = vector.load %arg5[%c0_11, %c0_12] : memref<1x128xf32, #tpu.memory_space<vmem>>, vector<1x128xf32>
    %14 = vector.broadcast %13 : vector<1x128xf32> to vector<8x128xf32>
    %15 = arith.addf %12, %14 : vector<8x128xf32>
    %16 = arith.truncf %15 : vector<8x128xf32> to vector<8x128xbf16>
    %c0_13 = arith.constant 0 : index
    %c0_14 = arith.constant 0 : index
    %17 = vector.load %arg6[%c0_13, %c0_14] : memref<128x128xbf16, #tpu.memory_space<vmem>>, vector<128x128xbf16>
    %cst_15 = arith.constant dense<0.000000e+00> : vector<8x128xf32>
    %18 = tpu.matmul %16, %17, %cst_15 {dimension_numbers = #tpu.dot_dimension_numbers<[1], [0], [0], [1], [0, 0, 1, 1], [], []>} : vector<8x128xbf16>, vector<128x128xbf16>, vector<8x128xf32> -> vector<8x128xf32>
    %c0_16 = arith.constant 0 : index
    %c0_17 = arith.constant 0 : index
    %19 = vector.load %arg7[%c0_16, %c0_17] : memref<1x128xf32, #tpu.memory_space<vmem>>, vector<1x128xf32>
    %20 = vector.broadcast %19 : vector<1x128xf32> to vector<8x128xf32>
    %21 = arith.addf %18, %20 : vector<8x128xf32>
    %22 = arith.negf %21 : vector<8x128xf32>
    %23 = math.exp %22 : vector<8x128xf32>
    %cst_18 = arith.constant 1.000000e+00 : f32
    %24 = vector.broadcast %cst_18 : f32 to vector<8x128xf32>
    %25 = arith.addf %24, %23 : vector<8x128xf32>
    %26 = arith.divf %24, %25 : vector<8x128xf32>
    %c0_19 = arith.constant 0 : index
    %c0_20 = arith.constant 0 : index
    %27 = vector.load %arg8[%c0_19, %c0_20] : memref<8x128xf32, #tpu.memory_space<vmem>>, vector<8x128xf32>
    tpu.vector_store %arg8[%c0_19, %c0_20], %26 {strides = array<i32>} : memref<8x128xf32, #tpu.memory_space<vmem>>, vector<8x128xf32>,
    return
  }
  func.func @transform_0(%arg0: i32) -> (i32, i32, i32) {
    %c0_i32 = arith.constant 0 : i32
    %c0_i32_0 = arith.constant 0 : i32
    %c0_i32_1 = arith.constant 0 : i32
    return %arg0, %c0_i32, %c0_i32_0 : i32, i32, i32
  }
  func.func @transform_1(%arg0: i32) -> (i32, i32) {
    %c0_i32 = arith.constant 0 : i32
    %c0_i32_0 = arith.constant 0 : i32
    %c0_i32_1 = arith.constant 0 : i32
    return %c0_i32, %c0_i32_0 : i32, i32
  }
  func.func @transform_2(%arg0: i32) -> (i32, i32) {
    %c0_i32 = arith.constant 0 : i32
    %c0_i32_0 = arith.constant 0 : i32
    %c0_i32_1 = arith.constant 0 : i32
    return %c0_i32, %c0_i32_0 : i32, i32
  }
  func.func @transform_3(%arg0: i32) -> (i32, i32) {
    %c0_i32 = arith.constant 0 : i32
    %c0_i32_0 = arith.constant 0 : i32
    %c0_i32_1 = arith.constant 0 : i32
    return %c0_i32, %c0_i32_0 : i32, i32
  }
  func.func @transform_4(%arg0: i32) -> (i32, i32) {
    %c0_i32 = arith.constant 0 : i32
    %c0_i32_0 = arith.constant 0 : i32
    %c0_i32_1 = arith.constant 0 : i32
    return %c0_i32, %c0_i32_0 : i32, i32
  }
  func.func @transform_5(%arg0: i32) -> (i32, i32) {
    %c0_i32 = arith.constant 0 : i32
    %c0_i32_0 = arith.constant 0 : i32
    %c0_i32_1 = arith.constant 0 : i32
    return %c0_i32, %c0_i32_0 : i32, i32
  }
  func.func @transform_6(%arg0: i32) -> (i32, i32) {
    %c0_i32 = arith.constant 0 : i32
    %c0_i32_0 = arith.constant 0 : i32
    %c0_i32_1 = arith.constant 0 : i32
    return %c0_i32, %c0_i32_0 : i32, i32
  }
  func.func @transform_7(%arg0: i32) -> (i32, i32) {
    %c0_i32 = arith.constant 0 : i32
    %c0_i32_0 = arith.constant 0 : i32
    return %arg0, %c0_i32 : i32, i32
  }
}

</mosaic_0001>

<bundles_post_ra>
// kernel: forward.1
= control target key start
LH: loop header
LB: loop body
LE: loop exit
PB: predicated region body
PF: predicated region fallthrough
CT: control target
= control target key end

     0   :  { %v931_v33 = vmov 0.0   ;;  %vm932_vm0 = vmmov 0   ;;  %vm469_vm1 = vcmask 1041409   ;;  %vm471_vm2 = vcmask 1042434   ;;  %s1172_s1 = inlined_call_operand.vmem [shape: bf16[256,128], index: 1, kind: input, shape index: {}]   ;;  %s1173_s0 = inlined_call_operand.vmem [shape: bf16[8,16,256], index: 0, kind: input, shape index: {}]   ;;  %s1174_s3 = inlined_call_operand.vmem [shape: bf16[128,128], index: 3, kind: input, shape index: {}]   ;;  %s1175_s5 = inlined_call_operand.vmem [shape: bf16[128,128], index: 5, kind: input, shape index: {}]   ;;  %s1176_s2 = inlined_call_operand.vmem [shape: f32[16,128], index: 2, kind: input, shape index: {}]   ;;  %s1177_s4 = inlined_call_operand.vmem [shape: f32[1,128], index: 4, kind: input, shape index: {}, may-alias: {4,6}]   ;;  %s1178_s6 = inlined_call_operand.vmem [shape: f32[1,128], index: 6, kind: input, shape index: {}, may-alias: {4,6}]   ;;  %s1179_s7 = inlined_call_operand.vmem [shape: f32[8,128], index: 7, kind: output, shape index: {}]  }
   0x1   :  { %v871_v0 = vld [vmem:[%s1172_s1 + $0x40] sm:$0xff]   ;;  %v873_v2 = vld [vmem:[%s1172_s1 + $0x48] sm:$0xff]   ;;  %v875_v4 = vld [vmem:[%s1172_s1 + $0x50] sm:$0xff]   ;;  %829 = vmatprep.subr.bf16.mxu1 %v931_v33  ;;  %845 = vmatprep.mubr.msk.bf16.mxu1 %vm932_vm0, %v931_v33  ;;  %vm473_vm3 = vcmask 1043459   ;;  %vm475_vm4 = vcmask 1044484   ;;  %vm477_vm5 = vcmask 1045509  }
   0x2   :  { %v872_v1 = vld [vmem:[%s1172_s1] sm:$0xff]   ;;  %747 = vmatprep.subr.bf16.mxu0 %v871_v0  ;;  %v874_v3 = vld [vmem:[%s1172_s1 + $0x8] sm:$0xff]   ;;  %v876_v5 = vld [vmem:[%s1172_s1 + $0x10] sm:$0xff]   ;;  %vm479_vm6 = vcmask 1046534   ;;  %vm481_vm7 = vcmask 1047559  }
   0x3   :  { %748 = vmatpush3.bf16.msra.mxu0 %v872_v1  ;;  %v877_v6 = vld [vmem:[%s1172_s1 + $0x58] sm:$0xff]   ;;  %v879_v8 = vld [vmem:[%s1172_s1 + $0x60] sm:$0xff]   ;;  %v881_v10 = vld [vmem:[%s1172_s1 + $0x68] sm:$0xff]  }
   0x4   :  { %749 = vmatprep.subr.bf16.mxu0 %v873_v2  ;;  %v878_v7 = vld [vmem:[%s1172_s1 + $0x18] sm:$0xff]   ;;  %v880_v9 = vld [vmem:[%s1172_s1 + $0x20] sm:$0xff]   ;;  %v882_v12 = vld [vmem:[%s1172_s1 + $0x28] sm:$0xff]  }
   0x5   :  { %v889_v11 = vld [vmem:[%s1173_s0 + $0x4] ss:$8 sps:$4 sm:$0xff]   ;;  %v883_v13 = vld [vmem:[%s1172_s1 + $0x70] sm:$0xff]   ;;  %v885_v15 = vld [vmem:[%s1172_s1 + $0x78] sm:$0xff]  }
   0x6   :  { %285 = vmatprep.mubr.bf16.mxu0 %v889_v11  ;;  %v884_v14 = vld [vmem:[%s1172_s1 + $0x30] sm:$0xff]   ;;  %v886_v16 = vld [vmem:[%s1172_s1 + $0x38] sm:$0xff]   ;;  %v887_v17 = vld [vmem:[%s1173_s0] ss:$8 sps:$4 sm:$0xff]  }
   0x7   :  { %750 = vmatpush3.bf16.msra.mxu0 %v874_v3  ;;  %v890_v18 = vld [vmem:[%s1173_s0 + $0x14] ss:$8 sps:$4 sm:$0xff]   ;;  %v892_v19 = vld [vmem:[%s1173_s0 + $0x10] ss:$8 sps:$4 sm:$0xff]   ;;  %v893_v20 = vld [vmem:[%s1173_s0 + $0x24] ss:$8 sps:$4 sm:$0xff]  }
   0x8   :  { %751 = vmatprep.subr.bf16.mxu0 %v875_v4  ;;  %v895_v21 = vld [vmem:[%s1173_s0 + $0x20] ss:$8 sps:$4 sm:$0xff]   ;;  %v896_v22 = vld [vmem:[%s1173_s0 + $0x34] ss:$8 sps:$4 sm:$0xff]   ;;  %v898_v23 = vld [vmem:[%s1173_s0 + $0x30] ss:$8 sps:$4 sm:$0xff]  }
   0x9   :  { %v899_v24 = vld [vmem:[%s1173_s0 + $0x44] ss:$8 sps:$4 sm:$0xff]   ;;  %v901_v25 = vld [vmem:[%s1173_s0 + $0x40] ss:$8 sps:$4 sm:$0xff]   ;;  %v902_v26 = vld [vmem:[%s1173_s0 + $0x54] ss:$8 sps:$4 sm:$0xff]  }
   0xa   :  { %v904_v27 = vld [vmem:[%s1173_s0 + $0x50] ss:$8 sps:$4 sm:$0xff]   ;;  %v905_v28 = vld [vmem:[%s1173_s0 + $0x64] ss:$8 sps:$4 sm:$0xff]   ;;  %v907_v29 = vld [vmem:[%s1173_s0 + $0x60] ss:$8 sps:$4 sm:$0xff]  }
   0xb   :  { %752 = vmatpush3.bf16.msra.mxu0 %v876_v5  ;;  %v908_v30 = vld [vmem:[%s1173_s0 + $0x74] ss:$8 sps:$4 sm:$0xff]   ;;  %v910_v31 = vld [vmem:[%s1173_s0 + $0x70] ss:$8 sps:$4 sm:$0xff]   ;;  %v911_v32 = vld [vmem:[%s1174_s3] sm:$0xff]  }
   0xc   :  { %753 = vmatprep.subr.bf16.mxu0 %v877_v6  ;;  %830 = vmatpush3.bf16.msra.mxu1 %v911_v32  ;;  %v912_v34 = vld [vmem:[%s1174_s3 + $0x8] sm:$0xff]   ;;  %v913_v35 = vld [vmem:[%s1174_s3 + $0x10] sm:$0xff]   ;;  %v914_v36 = vld [vmem:[%s1174_s3 + $0x18] sm:$0xff]  }
   0xd   :  { %831 = vmatprep.subr.bf16.mxu1 %v931_v33  ;;  %v915_v37 = vld [vmem:[%s1174_s3 + $0x20] sm:$0xff]   ;;  %v916_v38 = vld [vmem:[%s1174_s3 + $0x28] sm:$0xff]   ;;  %v917_v39 = vld [vmem:[%s1174_s3 + $0x30] sm:$0xff]  }
   0xe   :  { %v918_v40 = vld [vmem:[%s1174_s3 + $0x38] sm:$0xff]   ;;  %v1107_v42 = vld [vmem:[%s1176_s2] sm:$0xff]  ;;  %v1112_v46 = vld [vmem:[%s1176_s2 + $0x8] sm:$0xff] }
   0xf   :  { %754 = vmatpush3.bf16.msra.mxu0 %v878_v7 }
  0x10   :  { %755 = vmatprep.subr.bf16.mxu0 %v879_v8  ;;  %832 = vmatpush3.bf16.msra.mxu1 %v912_v34 }
  0x11   :  { %833 = vmatprep.subr.bf16.mxu1 %v931_v33 }
  0x13   :  { %756 = vmatpush3.bf16.msra.mxu0 %v880_v9 }
  0x14   :  { %757 = vmatprep.subr.bf16.mxu0 %v881_v10  ;;  %834 = vmatpush3.bf16.msra.mxu1 %v913_v35 }
  0x15   :  { %835 = vmatprep.subr.bf16.mxu1 %v931_v33 }
  0x17   :  { %758 = vmatpush3.bf16.msra.mxu0 %v882_v12 }
  0x18   :  { %759 = vmatprep.subr.bf16.mxu0 %v883_v13  ;;  %836 = vmatpush3.bf16.msra.mxu1 %v914_v36 }
  0x19   :  { %837 = vmatprep.subr.bf16.mxu1 %v931_v33 }
  0x1b   :  { %760 = vmatpush3.bf16.msra.mxu0 %v884_v14 }
  0x1c   :  { %761 = vmatprep.subr.bf16.mxu0 %v885_v15  ;;  %838 = vmatpush3.bf16.msra.mxu1 %v915_v37 }
  0x1d   :  { %839 = vmatprep.subr.bf16.mxu1 %v931_v33 }
  0x1f   :  { %762 = vmatpush3.bf16.msra.mxu0 %v886_v16 }
  0x20   :  { %840 = vmatpush3.bf16.msra.mxu1 %v916_v38 }
  0x21   :  { %841 = vmatprep.subr.bf16.mxu1 %v931_v33 }
  0x22   :  { %286 = vmatmul.mubr.bf16.vlgmr.msra.gmra.mrb[0].mxu0 %v887_v17 }
  0x23   :  { %293 = vmatprep.mubr.bf16.mxu0 %v890_v18 }
  0x24   :  { %842 = vmatpush3.bf16.msra.mxu1 %v917_v39 }
  0x25   :  { %843 = vmatprep.subr.bf16.mxu1 %v931_v33 }
  0x28   :  { %844 = vmatpush3.bf16.msra.mxu1 %v918_v40 }
  0x29   :  { %849 = vmatprep.subr.bf16.mxu1 %v931_v33 }
  0x2a   :  { %294 = vmatmul.mubr.bf16.gmra.mrb[4].mxu0 %v892_v19 }
  0x2b   :  { %301 = vmatprep.mubr.bf16.mxu0 %v893_v20 }
  0x32   :  { %302 = vmatmul.mubr.bf16.gmra.mrb[8].mxu0 %v895_v21 }
  0x33   :  { %309 = vmatprep.mubr.bf16.mxu0 %v896_v22 }
  0x3a   :  { %310 = vmatmul.mubr.bf16.gmra.mrb[12].mxu0 %v898_v23 }
  0x3b   :  { %317 = vmatprep.mubr.bf16.mxu0 %v899_v24 }
  0x42   :  { %318 = vmatmul.mubr.bf16.gmra.mrb[16].mxu0 %v901_v25 }
  0x43   :  { %325 = vmatprep.mubr.bf16.mxu0 %v902_v26 }
  0x4a   :  { %326 = vmatmul.mubr.bf16.gmra.mrb[20].mxu0 %v904_v27 }
  0x4b   :  { %333 = vmatprep.mubr.bf16.mxu0 %v905_v28 }
  0x52   :  { %334 = vmatmul.mubr.bf16.gmra.mrb[24].mxu0 %v907_v29 }
  0x53   :  { %341 = vmatprep.mubr.bf16.mxu0 %v908_v30 }
  0x5a   :  { %342 = vmatmul.mubr.bf16.gmra.mrb[28].mxu0 %v910_v31 }
  0xf5   :  { %v763_v41 = vpop.f32.mrb[0].mxu0 }
  0xf6   :  { %v764_v43 = vpop.f32.mrb[1].mxu0 }
  0xf7   :  { %v765_v44 = vadd.f32 %v764_v43, %v763_v41  ;;  %v766_v45 = vpop.f32.mrb[2].mxu0 }
  0xf8   :  { %v767_v47 = vpop.f32.mrb[3].mxu0 }
  0xf9   :  { %v288_v48 = vadd.f32 %v765_v44, %v1107_v42  ;;  %v768_v49 = vadd.f32 %v767_v47, %v766_v45 }
  0xfb   :  { %v291_v50 = vadd.f32 %v768_v49, %v1112_v46  ;;  %v350_v51 = vmax.f32 %v288_v48, 0.0 }
  0xfd   :  { %v351_v52 = vmax.f32 %v291_v50, 0.0  ;;  %v769_v53 = vpop.f32.mrb[4].mxu0 }
  0xfe   :  { %v770_v54 = vpop.f32.mrb[5].mxu0 }
  0xff   :  { %v366_v55 = vmax.f32 %v350_v51, %v351_v52  ;;  %v771_v56 = vadd.f32 %v770_v54, %v769_v53  ;;  %v772_v57 = vpop.f32.mrb[6].mxu0 }
 0x100   :  { %v773_v58 = vpop.f32.mrb[7].mxu0 }
 0x101   :  { %v367_v59 = vrot.slane %v366_v55, 4  ;;  %v296_v60 = vadd.f32 %v771_v56, %v1107_v42  ;;  %v774_v61 = vadd.f32 %v773_v58, %v772_v57 }
 0x103   :  { %v368_v62 = vmax.f32 %v366_v55, %v367_v59  ;;  %v299_v63 = vadd.f32 %v774_v61, %v1112_v46  ;;  %v352_v1 = vmax.f32 %v296_v60, 0.0 }
 0x105   :  { %v369_v0 = vrot.slane %v368_v62, 2  ;;  %v353_v2 = vmax.f32 %v299_v63, 0.0  ;;  %v775_v3 = vpop.f32.mrb[8].mxu0 }
 0x106   :  { %v776_v4 = vpop.f32.mrb[9].mxu0 }
 0x107   :  { %v370_v5 = vmax.f32 %v368_v62, %v369_v0  ;;  %v373_v6 = vmax.f32 %v352_v1, %v353_v2  ;;  %v777_v7 = vadd.f32 %v776_v4, %v775_v3  ;;  %v778_v8 = vpop.f32.mrb[10].mxu0 }
 0x108   :  { %v779_v9 = vpop.f32.mrb[11].mxu0 }
 0x109   :  { %v374_v10 = vrot.slane %v373_v6, 4  ;;  %v304_v11 = vadd.f32 %v777_v7, %v1107_v42  ;;  %v780_v12 = vadd.f32 %v779_v9, %v778_v8  ;;  %v371_v13 = vrot.slane %v370_v5, 1 }
 0x10b   :  { %v375_v14 = vmax.f32 %v373_v6, %v374_v10  ;;  %v307_v15 = vadd.f32 %v780_v12, %v1112_v46  ;;  %v354_v17 = vmax.f32 %v304_v11, 0.0  ;;  %v372_v20 = vmax.f32 %v370_v5, %v371_v13 }
 0x10d   :  { %v376_v16 = vrot.slane %v375_v14, 2  ;;  %v355_v18 = vmax.f32 %v307_v15, 0.0  ;;  %v781_v19 = vpop.f32.mrb[12].mxu0  ;;  %v422_v31 = vpack.c.bf16 %v372_v20, %v372_v20 }
 0x10e   :  { %v782_v21 = vpop.f32.mrb[13].mxu0 }
 0x10f   :  { %v377_v22 = vmax.f32 %v375_v14, %v376_v16  ;;  %v380_v23 = vmax.f32 %v354_v17, %v355_v18  ;;  %v783_v24 = vadd.f32 %v782_v21, %v781_v19  ;;  %v784_v25 = vpop.f32.mrb[14].mxu0  ;;  %v461_v41 = vunpack.c.l.b16 %v422_v31 }
 0x110   :  { %v785_v26 = vpop.f32.mrb[15].mxu0 }
 0x111   :  { %v378_v27 = vrot.slane %v377_v22, 1  ;;  %v381_v28 = vrot.slane %v380_v23, 4  ;;  %v312_v29 = vadd.f32 %v783_v24, %v1107_v42  ;;  %v786_v30 = vadd.f32 %v785_v26, %v784_v25 }
 0x113   :  { %v379_v32 = vmax.f32 %v377_v22, %v378_v27  ;;  %v382_v34 = vmax.f32 %v380_v23, %v381_v28  ;;  %v315_v35 = vadd.f32 %v786_v30, %v1112_v46  ;;  %v356_v38 = vmax.f32 %v312_v29, 0.0 }
 0x115   :  { %v423_v36 = vpack.c.bf16 %v379_v32, %v379_v32  ;;  %v383_v37 = vrot.slane %v382_v34, 2  ;;  %v357_v39 = vmax.f32 %v315_v35, 0.0  ;;  %v787_v40 = vpop.f32.mrb[16].mxu0 }
 0x116   :  { %v788_v43 = vpop.f32.mrb[17].mxu0 }
 0x117   :  { %v462_v44 = vunpack.c.l.b16 %v423_v36  ;;  %v384_v45 = vmax.f32 %v382_v34, %v383_v37  ;;  %v387_v47 = vmax.f32 %v356_v38, %v357_v39  ;;  %v789_v48 = vadd.f32 %v788_v43, %v787_v40  ;;  %v790_v49 = vpop.f32.mrb[18].mxu0 }
 0x118   :  { %v791_v50 = vpop.f32.mrb[19].mxu0 }
 0x119   :  { %v470_v51 = vsel %vm469_vm1, %v462_v44, %v461_v41  ;;  %v385_v52 = vrot.slane %v384_v45, 1  ;;  %v388_v53 = vrot.slane %v387_v47, 4  ;;  %v320_v54 = vadd.f32 %v789_v48, %v1107_v42 }
 0x11a   :  { %v792_v55 = vadd.f32 %v791_v50, %v790_v49 }
 0x11b   :  { %v386_v56 = vmax.f32 %v384_v45, %v385_v52  ;;  %v389_v57 = vmax.f32 %v387_v47, %v388_v53  ;;  %v358_v62 = vmax.f32 %v320_v54, 0.0 }
 0x11c   :  { %v323_v58 = vadd.f32 %v792_v55, %v1112_v46 }
 0x11d   :  { %v424_v59 = vpack.c.bf16 %v386_v56, %v386_v56  ;;  %v390_v60 = vrot.slane %v389_v57, 2  ;;  %v793_v61 = vpop.f32.mrb[20].mxu0 }
 0x11e   :  { %v359_v63 = vmax.f32 %v323_v58, 0.0  ;;  %v794_v0 = vpop.f32.mrb[21].mxu0 }
 0x11f   :  { %v463_v1 = vunpack.c.l.b16 %v424_v59  ;;  %v391_v2 = vmax.f32 %v389_v57, %v390_v60  ;;  %v795_v3 = vadd.f32 %v794_v0, %v793_v61  ;;  %v796_v4 = vpop.f32.mrb[22].mxu0 }
 0x120   :  { %v394_v5 = vmax.f32 %v358_v62, %v359_v63  ;;  %v797_v6 = vpop.f32.mrb[23].mxu0 }
 0x121   :  { %v392_v7 = vrot.slane %v391_v2, 1  ;;  %v328_v8 = vadd.f32 %v795_v3, %v1107_v42  ;;  %v798_v9 = vadd.f32 %v797_v6, %v796_v4  ;;  %v472_v10 = vsel %vm471_vm2, %v463_v1, %v470_v51 }
 0x122   :  { %v395_v11 = vrot.slane %v394_v5, 4 }
 0x123   :  { %v393_v12 = vmax.f32 %v391_v2, %v392_v7  ;;  %v331_v13 = vadd.f32 %v798_v9, %v1112_v46  ;;  %v360_v16 = vmax.f32 %v328_v8, 0.0 }
 0x124   :  { %v396_v14 = vmax.f32 %v394_v5, %v395_v11 }
 0x125   :  { %v425_v15 = vpack.c.bf16 %v393_v12, %v393_v12  ;;  %v361_v17 = vmax.f32 %v331_v13, 0.0  ;;  %v799_v18 = vpop.f32.mrb[24].mxu0 }
 0x126   :  { %v397_v19 = vrot.slane %v396_v14, 2  ;;  %v800_v20 = vpop.f32.mrb[25].mxu0 }
 0x127   :  { %v464_v21 = vunpack.c.l.b16 %v425_v15  ;;  %v401_v22 = vmax.f32 %v360_v16, %v361_v17  ;;  %v801_v23 = vadd.f32 %v800_v20, %v799_v18  ;;  %v802_v24 = vpop.f32.mrb[26].mxu0  ;;  %v920_v16 = vld [vmem:[%s1175_s5 + $0x8] sm:$0xff]   ;;  %v921_v17 = vld [vmem:[%s1175_s5 + $0x10] sm:$0xff]   ;;  %v922_v18 = vld [vmem:[%s1175_s5 + $0x18] sm:$0xff]  }
 0x128   :  { %v398_v25 = vmax.f32 %v396_v14, %v397_v19  ;;  %v803_v26 = vpop.f32.mrb[27].mxu0  ;;  %v919_v14 = vld [vmem:[%s1175_s5] sm:$0xff]   ;;  %v924_v20 = vld [vmem:[%s1175_s5 + $0x28] sm:$0xff]  }
 0x129   :  { %v402_v27 = vrot.slane %v401_v22, 4  ;;  %v336_v28 = vadd.f32 %v801_v23, %v1107_v42  ;;  %v804_v29 = vadd.f32 %v803_v26, %v802_v24  ;;  %v474_v30 = vsel %vm473_vm3, %v464_v21, %v472_v10  ;;  %v923_v19 = vld [vmem:[%s1175_s5 + $0x20] sm:$0xff]   ;;  %v925_v21 = vld [vmem:[%s1175_s5 + $0x30] sm:$0xff]  }
 0x12a   :  { %v399_v31 = vrot.slane %v398_v25, 1  ;;  %v728_v23 = vld [vmem:[%s1177_s4] ss:$0 sm:$0xff] }
 0x12b   :  { %v403_v32 = vmax.f32 %v401_v22, %v402_v27  ;;  %v339_v34 = vadd.f32 %v804_v29, %v1112_v46  ;;  %v362_v37 = vmax.f32 %v336_v28, 0.0  ;;  %v926_v22 = vld [vmem:[%s1175_s5 + $0x38] sm:$0xff]  }
 0x12c   :  { %v400_v35 = vmax.f32 %v398_v25, %v399_v31 }
 0x12d   :  { %v404_v36 = vrot.slane %v403_v32, 2  ;;  %v363_v38 = vmax.f32 %v339_v34, 0.0  ;;  %v805_v39 = vpop.f32.mrb[28].mxu0 }
 0x12e   :  { %v426_v40 = vpack.c.bf16 %v400_v35, %v400_v35  ;;  %v806_v41 = vpop.f32.mrb[29].mxu0 }
 0x12f   :  { %v405_v43 = vmax.f32 %v403_v32, %v404_v36  ;;  %v408_v44 = vmax.f32 %v362_v37, %v363_v38  ;;  %v807_v45 = vadd.f32 %v806_v41, %v805_v39  ;;  %v808_v47 = vpop.f32.mrb[30].mxu0 }
 0x130   :  { %v465_v48 = vunpack.c.l.b16 %v426_v40  ;;  %v809_v49 = vpop.f32.mrb[31].mxu0 }
 0x131   :  { %v406_v50 = vrot.slane %v405_v43, 1  ;;  %v409_v51 = vrot.slane %v408_v44, 4  ;;  %v344_v52 = vadd.f32 %v807_v45, %v1107_v42  ;;  %v810_v53 = vadd.f32 %v809_v49, %v808_v47 }
 0x132   :  { %v476_v54 = vsel %vm475_vm4, %v465_v48, %v474_v30 }
 0x133   :  { %v407_v55 = vmax.f32 %v405_v43, %v406_v50  ;;  %v410_v56 = vmax.f32 %v408_v44, %v409_v51  ;;  %v347_v57 = vadd.f32 %v810_v53, %v1112_v46  ;;  %v364_v60 = vmax.f32 %v344_v52, 0.0 }
 0x135   :  { %v427_v58 = vpack.c.bf16 %v407_v55, %v407_v55  ;;  %v411_v59 = vrot.slane %v410_v56, 2  ;;  %v365_v61 = vmax.f32 %v347_v57, 0.0 }
 0x137   :  { %v466_v62 = vunpack.c.l.b16 %v427_v58  ;;  %v412_v63 = vmax.f32 %v410_v56, %v411_v59  ;;  %v415_v0 = vmax.f32 %v364_v60, %v365_v61 }
 0x139   :  { %v413_v1 = vrot.slane %v412_v63, 1  ;;  %v416_v2 = vrot.slane %v415_v0, 4  ;;  %v478_v3 = vsel %vm477_vm5, %v466_v62, %v476_v54 }
 0x13b   :  { %v414_v4 = vmax.f32 %v412_v63, %v413_v1  ;;  %v417_v5 = vmax.f32 %v415_v0, %v416_v2 }
 0x13d   :  { %v418_v42 = vrot.slane %v417_v5, 2  ;;  %v428_v6 = vpack.c.bf16 %v414_v4, %v414_v4 }
 0x13f   :  { %v419_v7 = vmax.f32 %v417_v5, %v418_v42  ;;  %v467_v8 = vunpack.c.l.b16 %v428_v6 }
 0x141   :  { %v420_v9 = vrot.slane %v419_v7, 1  ;;  %v480_v46 = vsel %vm479_vm6, %v467_v8, %v478_v3 }
 0x143   :  { %v421_v10 = vmax.f32 %v419_v7, %v420_v9 }
 0x145   :  { %v429_v11 = vpack.c.bf16 %v421_v10, %v421_v10 }
 0x147   :  { %v468_v12 = vunpack.c.l.b16 %v429_v11 }
 0x149   :  { %v482_v13 = vsel %vm481_vm7, %v468_v12, %v480_v46 }
 0x14a   :  { %v483_v15 = vpack.c.b16 %v482_v13, %v482_v13 }
 0x14c   :  { %846 = vmatmul.mubr.bf16.vlgmr.msra.gmra.mrb[0].mxu1 %v483_v15 }
 0x14d   :  { %850 = vmatpush3.bf16.msra.mxu1 %v919_v14  ;;  %865 = vmatprep.mubr.msk.bf16.mxu1 %vm932_vm0, %v931_v33 }
 0x14e   :  { %851 = vmatprep.subr.bf16.mxu1 %v931_v33 }
 0x151   :  { %852 = vmatpush3.bf16.msra.mxu1 %v920_v16 }
 0x152   :  { %853 = vmatprep.subr.bf16.mxu1 %v931_v33 }
 0x155   :  { %854 = vmatpush3.bf16.msra.mxu1 %v921_v17 }
 0x156   :  { %855 = vmatprep.subr.bf16.mxu1 %v931_v33 }
 0x159   :  { %856 = vmatpush3.bf16.msra.mxu1 %v922_v18 }
 0x15a   :  { %857 = vmatprep.subr.bf16.mxu1 %v931_v33 }
 0x15d   :  { %858 = vmatpush3.bf16.msra.mxu1 %v923_v19 }
 0x15e   :  { %859 = vmatprep.subr.bf16.mxu1 %v931_v33 }
 0x161   :  { %860 = vmatpush3.bf16.msra.mxu1 %v924_v20 }
 0x162   :  { %861 = vmatprep.subr.bf16.mxu1 %v931_v33 }
 0x165   :  { %862 = vmatpush3.bf16.msra.mxu1 %v925_v21 }
 0x166   :  { %863 = vmatprep.subr.bf16.mxu1 %v931_v33  ;;  %v737_v33 = vld [vmem:[%s1178_s6] ss:$0 sm:$0xff] }
 0x169   :  { %864 = vmatpush3.bf16.msra.mxu1 %v926_v22 }
 0x21f   :  { %v567_v24 = vpop.f32.mrb[0].mxu1 }
 0x220   :  { %v568_v25 = vadd.f32 %v728_v23, %v567_v24  ;;  %v847_v26 = vpop.f32.mrb[1].mxu1 }
 0x221   :  { %v570_v27 = vpop.f32.mrb[2].mxu1 }
 0x222   :  { %v573_v28 = vpack.c.bf16 %v568_v25, %v568_v25  ;;  %v848_v29 = vpop.f32.mrb[3].mxu1 }
 0x224   :  { %866 = vmatmul.mubr.bf16.vlgmr.msra.gmra.mrb[4].mxu1 %v573_v28 }
 0x2f7   :  { %v679_v30 = vpop.f32.mrb[4].mxu1 }
 0x2f8   :  { %v680_v31 = vadd.f32 %v737_v33, %v679_v30  ;;  %v867_v32 = vpop.f32.mrb[5].mxu1 }
 0x2f9   :  { %v682_v34 = vpop.f32.mrb[6].mxu1 }
 0x2fa   :  { %v746_v35 = vmul.f32 -1.442695, %v680_v31  ;;  %v868_v36 = vpop.f32.mrb[7].mxu1 }
 0x2fc   :  { %927 = vpow2.f32 %v746_v35 }
 0x306   :  { %v928_v37 = vpop.eup %927 }
 0x307   :  { %v688_v38 = vadd.f32 1.0, %v928_v37 }
 0x309   :  { %929 = vrcp.f32 %v688_v38 }
 0x313   :  { %v930_v39 = vpop.eup %929 }
 0x314   :  { %691 = vst [vmem:[%s1179_s7] sm:$0xff] %v930_v39 }

</bundles_post_ra>
